<compile_context>
chip_gen: v5e
topology: v5e:2x2
jax: 0.10.0
libtpu: 0.0.40
codegen_flags: <defaults>
</compile_context>

<pallas_src>
import functools

import jax
import jax.numpy as jnp
from jax.experimental import pallas as pl
from jax.experimental.pallas import tpu as pltpu


def glnet_kernel(x_ref, win_ref, bin_ref, whh_ref, h0_ref, c0_ref,
                 woutf_ref, woutb_ref, bout_ref,
                 out_ref,
                 xg_ref, fwd_ref, bwd_ref,
                 *, T, Hd):
    """Fused bidirectional LSTM (batch=1) + linear + softmax.

    Layouts (prepared by the wrapper):
      x_ref    : (T, 2E)    rows are [x_t, x_{T-1-t}]
      win_ref  : (2E, 8Hd)  block-diagonal input weights (gate-major, dir-minor)
      bin_ref  : (1, 8Hd)   fused (b_ih + b_hh) biases, same column layout
      whh_ref  : (2Hd, 8Hd) block-diagonal recurrent weights
      h0/c0    : (1, 2Hd)   [fwd, bwd] initial state
      woutf/b  : (2Hd, Vp)  per-direction output weights, zero padded
      bout_ref : (1, Vp)    output bias, -1e30 in vocab-padding columns
      out_ref  : (T, Vp)    softmax probabilities (valid region [:, :V])
    Scratch:
      xg_ref   : (T, 8Hd)   precomputed input-gate projections
      fwd_ref  : (T, 2Hd)   per-step stacked state written at row i
      bwd_ref  : (T, 2Hd)   per-step stacked state written at row T-1-i
    """
    H2 = 2 * Hd

    # One lane-dense matmul for the input projection of both directions and all
    # timesteps; bias folded in so the recurrence carries no bias add.
    xg_ref[...] = (jnp.dot(x_ref[...], win_ref[...],
                           preferred_element_type=jnp.float32)
                   + bin_ref[...])

    # Hoist the recurrent weights out of the loop (2 vregs, trivially resident).
    whh = whh_ref[...]

    h = h0_ref[...]                                             # (1, 2Hd)
    c = c0_ref[...]                                             # (1, 2Hd)

    # T is a small compile-time constant: a static Python loop gives immediate
    # addressing for every load/store and full LLO scheduling visibility.
    for i in range(T):
        gates = (xg_ref[pl.ds(i, 1), :]
                 + jnp.dot(h, whh, preferred_element_type=jnp.float32))  # (1, 8Hd)
        # Two full-row transcendentals instead of four narrow ones.
        sig = jax.nn.sigmoid(gates)
        th = jnp.tanh(gates)
        i_g = sig[:, 0 * H2:1 * H2]
        f_g = sig[:, 1 * H2:2 * H2]
        g_g = th[:, 2 * H2:3 * H2]
        o_g = sig[:, 3 * H2:4 * H2]
        c = f_g * c + i_g * g_g
        h = o_g * jnp.tanh(c)
        # Full-row stores at lane offset 0 only (sublane offset is static).
        fwd_ref[pl.ds(i, 1), :] = h
        bwd_ref[pl.ds(T - 1 - i, 1), :] = h

    # Output projection: the per-direction weight halves are zero padded in the
    # wrapper, so we never lane-slice the hidden-state scratch here.
    logits = (jnp.dot(fwd_ref[...], woutf_ref[...],
                      preferred_element_type=jnp.float32)
              + jnp.dot(bwd_ref[...], woutb_ref[...],
                        preferred_element_type=jnp.float32)
              + bout_ref[...])                                  # (T, Vp)
    m = jnp.max(logits, axis=1, keepdims=True)
    e = jnp.exp(logits - m)
    out_ref[...] = (e / jnp.sum(e, axis=1, keepdims=True)).astype(out_ref.dtype)


def init_glnet_params(key, vocab_size, embedding_dim, hidden_dim):
    """Deterministic parameter init mirroring the shapes in GLNet.__init__."""
    Hd = hidden_dim // 2
    keys = jax.random.split(key, 16)
    k_lstm = 1.0 / jnp.sqrt(Hd)
    k_lin = 1.0 / jnp.sqrt(hidden_dim)

    def unif(k, shape, scale):
        return jax.random.uniform(k, shape, jnp.float32, -scale, scale)

    params = {
        "embedding": jax.random.normal(keys[0], (vocab_size, embedding_dim),
                                       jnp.float32),
        # PyTorch LSTM weight layout: (4*Hd, in) with gate order i, f, g, o.
        "w_ih_f": unif(keys[1], (4 * Hd, embedding_dim), k_lstm),
        "w_hh_f": unif(keys[2], (4 * Hd, Hd), k_lstm),
        "b_ih_f": unif(keys[3], (4 * Hd,), k_lstm),
        "b_hh_f": unif(keys[4], (4 * Hd,), k_lstm),
        "w_ih_b": unif(keys[5], (4 * Hd, embedding_dim), k_lstm),
        "w_hh_b": unif(keys[6], (4 * Hd, Hd), k_lstm),
        "b_ih_b": unif(keys[7], (4 * Hd,), k_lstm),
        "b_hh_b": unif(keys[8], (4 * Hd,), k_lstm),
        # Linear: (vocab, hidden_dim) weight, (vocab,) bias.
        "w_out": unif(keys[9], (vocab_size, hidden_dim), k_lin),
        "b_out": unif(keys[10], (vocab_size,), k_lin),
        # init_hidden(): randn(2, 1, Hd) for both h0 and c0 (batch=1 squeezed).
        "h0": jax.random.normal(keys[11], (2, Hd), jnp.float32),
        "c0": jax.random.normal(keys[12], (2, Hd), jnp.float32),
    }
    return params


def glnet_forward(sequence, params, *, vocab_size, embedding_dim, hidden_dim):
    T = int(sequence.shape[0])
    E = embedding_dim
    Hd = hidden_dim // 2
    Vp = max(128, ((vocab_size + 127) // 128) * 128)   # lane-dense output width
    f32 = jnp.float32

    # Embedding gather is glue (plain JAX).
    embeds = params["embedding"][sequence].astype(f32)            # (T, E)
    # Each row carries both directions' inputs: [x_t, x_{T-1-t}].
    x_cat = jnp.concatenate([embeds, embeds[::-1]], axis=1)       # (T, 2E)

    # Fused 8*Hd gate axis: gate-major (i, f, g, o), direction-minor (fwd, bwd),
    # each block Hd wide.  Block-diagonal over the input rows (fwd rows then bwd).
    def fuse_gate_weights(w_f_t, w_b_t, rows_f, rows_b):
        n_rows = rows_f + rows_b
        w = jnp.zeros((n_rows, 4, 2, Hd), f32)
        w = w.at[:rows_f, :, 0, :].set(w_f_t.reshape(rows_f, 4, Hd))
        w = w.at[rows_f:, :, 1, :].set(w_b_t.reshape(rows_b, 4, Hd))
        return w.reshape(n_rows, 8 * Hd)

    w_in = fuse_gate_weights(params["w_ih_f"].T.astype(f32),
                             params["w_ih_b"].T.astype(f32), E, E)      # (2E, 8Hd)
    w_hh = fuse_gate_weights(params["w_hh_f"].T.astype(f32),
                             params["w_hh_b"].T.astype(f32), Hd, Hd)    # (2Hd, 8Hd)

    b_f = (params["b_ih_f"] + params["b_hh_f"]).reshape(4, Hd)
    b_b = (params["b_ih_b"] + params["b_hh_b"]).reshape(4, Hd)
    b_in = jnp.stack([b_f, b_b], axis=1).reshape(1, 8 * Hd).astype(f32)

    h0 = params["h0"].reshape(1, 2 * Hd).astype(f32)
    c0 = params["c0"].reshape(1, 2 * Hd).astype(f32)

    # Output projection split per direction; zero rows for the other direction,
    # zero columns + (-1e30) bias for the vocab padding (so softmax is unchanged).
    w_out_t = params["w_out"].T.astype(f32)                       # (2Hd, V)
    w_out_f = jnp.zeros((2 * Hd, Vp), f32).at[:Hd, :vocab_size].set(w_out_t[:Hd])
    w_out_b = jnp.zeros((2 * Hd, Vp), f32).at[Hd:, :vocab_size].set(w_out_t[Hd:])
    b_out = jnp.full((1, Vp), -1e30, f32).at[0, :vocab_size].set(
        params["b_out"].astype(f32))

    flops = (2 * T * (2 * E) * (8 * Hd)          # input projection
             + 2 * T * (2 * Hd) * (8 * Hd)       # recurrence
             + 2 * 2 * T * (2 * Hd) * Vp)        # output projection (two dots)
    transcendentals = T * (2 * 8 * Hd + 2 * Hd) + T * Vp
    bytes_accessed = 4 * (x_cat.size + w_in.size + b_in.size + w_hh.size
                          + h0.size + c0.size + w_out_f.size + w_out_b.size
                          + b_out.size + T * Vp)

    kernel = functools.partial(glnet_kernel, T=T, Hd=Hd)
    vmem = pl.BlockSpec(memory_space=pltpu.MemorySpace.VMEM)

    out = pl.pallas_call(
        kernel,
        out_shape=jax.ShapeDtypeStruct((T, Vp), f32),
        in_specs=[vmem] * 9,
        out_specs=vmem,
        scratch_shapes=[pltpu.VMEM((T, 8 * Hd), f32),    # xg
                        pltpu.VMEM((T, 2 * Hd), f32),    # fwd-ordered states
                        pltpu.VMEM((T, 2 * Hd), f32)],   # bwd-ordered states
        cost_estimate=pl.CostEstimate(flops=flops,
                                      transcendentals=transcendentals,
                                      bytes_accessed=bytes_accessed),
    )(x_cat, w_in, b_in, w_hh, h0, c0, w_out_f, w_out_b, b_out)

    return out[:, :vocab_size]


def glnet_reference(sequence, params, *, vocab_size, embedding_dim, hidden_dim):
    """Pure-JAX reference matching PyTorch nn.LSTM(bidirectional) + Linear + Softmax."""
    Hd = hidden_dim // 2
    embeds = params["embedding"][sequence]                        # (T, E)

    def run(w_ih, w_hh, b, h, c, xs):
        hs = []
        for t in range(xs.shape[0]):
            g = xs[t] @ w_ih.T + h @ w_hh.T + b
            i_g = jax.nn.sigmoid(g[0 * Hd:1 * Hd])
            f_g = jax.nn.sigmoid(g[1 * Hd:2 * Hd])
            g_g = jnp.tanh(g[2 * Hd:3 * Hd])
            o_g = jax.nn.sigmoid(g[3 * Hd:4 * Hd])
            c = f_g * c + i_g * g_g
            h = o_g * jnp.tanh(c)
            hs.append(h)
        return jnp.stack(hs)                                      # (T, Hd)

    b_f = params["b_ih_f"] + params["b_hh_f"]
    b_b = params["b_ih_b"] + params["b_hh_b"]
    hf = run(params["w_ih_f"], params["w_hh_f"], b_f,
             params["h0"][0], params["c0"][0], embeds)
    hb = run(params["w_ih_b"], params["w_hh_b"], b_b,
             params["h0"][1], params["c0"][1], embeds[::-1])[::-1]
    lstm_out = jnp.concatenate([hf, hb], axis=1)                  # (T, 2Hd)
    logits = lstm_out @ params["w_out"].T + params["b_out"]
    return jax.nn.softmax(logits, axis=1)


if __name__ == "__main__":
    vocab_size = 64
    embedding_dim = 16
    hidden_dim = 32
    seq_len = 8

    key = jax.random.PRNGKey(0)
    key_params, key_seq = jax.random.split(key)
    params = init_glnet_params(key_params, vocab_size, embedding_dim, hidden_dim)
    sequence = jax.random.randint(key_seq, (seq_len,), 0, vocab_size,
                                  dtype=jnp.int32)

    probs = glnet_forward(sequence, params,
                          vocab_size=vocab_size,
                          embedding_dim=embedding_dim,
                          hidden_dim=hidden_dim)
    jax.block_until_ready(probs)

    assert probs.shape == (seq_len, vocab_size)
    assert bool(jnp.all(jnp.isfinite(probs)))
    # softmax rows should sum to ~1 (vocab padding contributes exactly 0)
    assert bool(jnp.allclose(jnp.sum(probs, axis=1), 1.0, atol=1e-5))

    ref = glnet_reference(sequence, params,
                          vocab_size=vocab_size,
                          embedding_dim=embedding_dim,
                          hidden_dim=hidden_dim)
    assert bool(jnp.allclose(probs, ref, atol=2e-3)), \
        f"max abs diff {float(jnp.max(jnp.abs(probs - ref)))}"
    print("KERNEL_OK")
</pallas_src>

<mosaic_0001>
module attributes {stable_mosaic.version = 11 : i64} {
  func.func @glnet_kernel(%arg0: memref<8x32xf32, #tpu.memory_space<vmem>>, %arg1: memref<32x128xf32, #tpu.memory_space<vmem>>, %arg2: memref<1x128xf32, #tpu.memory_space<vmem>>, %arg3: memref<32x128xf32, #tpu.memory_space<vmem>>, %arg4: memref<1x32xf32, #tpu.memory_space<vmem>>, %arg5: memref<1x32xf32, #tpu.memory_space<vmem>>, %arg6: memref<32x128xf32, #tpu.memory_space<vmem>>, %arg7: memref<32x128xf32, #tpu.memory_space<vmem>>, %arg8: memref<1x128xf32, #tpu.memory_space<vmem>>, %arg9: memref<8x128xf32, #tpu.memory_space<vmem>>, %arg10: memref<8x128xf32, #tpu.memory_space<vmem>>, %arg11: memref<8x32xf32, #tpu.memory_space<vmem>>, %arg12: memref<8x32xf32, #tpu.memory_space<vmem>>) attributes {dimension_semantics = [], scalar_prefetch = 0 : i64, scratch_operands = 3 : i64, tpu.core_type = #tpu.core_type<tc>} {
    %c0 = arith.constant 0 : index
    %c0_0 = arith.constant 0 : index
    %0 = vector.load %arg0[%c0, %c0_0] : memref<8x32xf32, #tpu.memory_space<vmem>>, vector<8x32xf32>
    %c0_1 = arith.constant 0 : index
    %c0_2 = arith.constant 0 : index
    %1 = vector.load %arg1[%c0_1, %c0_2] : memref<32x128xf32, #tpu.memory_space<vmem>>, vector<32x128xf32>
    %cst = arith.constant dense<0.000000e+00> : vector<8x128xf32>
    %2 = tpu.matmul %0, %1, %cst {dimension_numbers = #tpu.dot_dimension_numbers<[1], [0], [0], [1], [0, 0, 1, 1], [], []>} : vector<8x32xf32>, vector<32x128xf32>, vector<8x128xf32> -> vector<8x128xf32>
    %c0_3 = arith.constant 0 : index
    %c0_4 = arith.constant 0 : index
    %3 = vector.load %arg2[%c0_3, %c0_4] : memref<1x128xf32, #tpu.memory_space<vmem>>, vector<1x128xf32>
    %4 = vector.broadcast %3 : vector<1x128xf32> to vector<8x128xf32>
    %5 = arith.addf %2, %4 : vector<8x128xf32>
    %c0_5 = arith.constant 0 : index
    %c0_6 = arith.constant 0 : index
    %6 = vector.load %arg10[%c0_5, %c0_6] : memref<8x128xf32, #tpu.memory_space<vmem>>, vector<8x128xf32>
    tpu.vector_store %arg10[%c0_5, %c0_6], %5 {strides = array<i32>} : memref<8x128xf32, #tpu.memory_space<vmem>>, vector<8x128xf32>,
    %c0_7 = arith.constant 0 : index
    %c0_8 = arith.constant 0 : index
    %7 = vector.load %arg3[%c0_7, %c0_8] : memref<32x128xf32, #tpu.memory_space<vmem>>, vector<32x128xf32>
    %c0_9 = arith.constant 0 : index
    %c0_10 = arith.constant 0 : index
    %8 = vector.load %arg4[%c0_9, %c0_10] : memref<1x32xf32, #tpu.memory_space<vmem>>, vector<1x32xf32>
    %c0_11 = arith.constant 0 : index
    %c0_12 = arith.constant 0 : index
    %9 = vector.load %arg5[%c0_11, %c0_12] : memref<1x32xf32, #tpu.memory_space<vmem>>, vector<1x32xf32>
    %c0_13 = arith.constant 0 : index
    %c0_14 = arith.constant 0 : index
    %10 = vector.load %arg10[%c0_13, %c0_14] : memref<8x128xf32, #tpu.memory_space<vmem>>, vector<1x128xf32>
    %cst_15 = arith.constant dense<0.000000e+00> : vector<1x128xf32>
    %11 = tpu.matmul %8, %7, %cst_15 {dimension_numbers = #tpu.dot_dimension_numbers<[1], [0], [0], [1], [0, 0, 1, 1], [], []>} : vector<1x32xf32>, vector<32x128xf32>, vector<1x128xf32> -> vector<1x128xf32>
    %12 = arith.addf %10, %11 : vector<1x128xf32>
    %13 = arith.negf %12 : vector<1x128xf32>
    %14 = math.exp %13 : vector<1x128xf32>
    %cst_16 = arith.constant 1.000000e+00 : f32
    %15 = vector.broadcast %cst_16 : f32 to vector<1x128xf32>
    %16 = arith.addf %15, %14 : vector<1x128xf32>
    %17 = arith.divf %15, %16 : vector<1x128xf32>
    %18 = math.tanh %12 : vector<1x128xf32>
    %19 = vector.extract_strided_slice %17 {offsets = [0, 0], sizes = [1, 32], strides = [1, 1]} : vector<1x128xf32> to vector<1x32xf32>
    %20 = vector.extract_strided_slice %17 {offsets = [0, 32], sizes = [1, 32], strides = [1, 1]} : vector<1x128xf32> to vector<1x32xf32>
    %21 = vector.extract_strided_slice %18 {offsets = [0, 64], sizes = [1, 32], strides = [1, 1]} : vector<1x128xf32> to vector<1x32xf32>
    %22 = vector.extract_strided_slice %17 {offsets = [0, 96], sizes = [1, 32], strides = [1, 1]} : vector<1x128xf32> to vector<1x32xf32>
    %23 = arith.mulf %20, %9 : vector<1x32xf32>
    %24 = arith.mulf %19, %21 : vector<1x32xf32>
    %25 = arith.addf %23, %24 : vector<1x32xf32>
    %26 = math.tanh %25 : vector<1x32xf32>
    %27 = arith.mulf %22, %26 : vector<1x32xf32>
    %c0_17 = arith.constant 0 : index
    %c0_18 = arith.constant 0 : index
    %28 = vector.load %arg11[%c0_17, %c0_18] : memref<8x32xf32, #tpu.memory_space<vmem>>, vector<1x32xf32>
    tpu.vector_store %arg11[%c0_17, %c0_18], %27 {strides = array<i32>} : memref<8x32xf32, #tpu.memory_space<vmem>>, vector<1x32xf32>,
    %c7 = arith.constant 7 : index
    %c0_19 = arith.constant 0 : index
    %29 = vector.load %arg12[%c7, %c0_19] : memref<8x32xf32, #tpu.memory_space<vmem>>, vector<1x32xf32>
    tpu.vector_store %arg12[%c7, %c0_19], %27 {strides = array<i32>} : memref<8x32xf32, #tpu.memory_space<vmem>>, vector<1x32xf32>,
    %c1 = arith.constant 1 : index
    %c0_20 = arith.constant 0 : index
    %30 = vector.load %arg10[%c1, %c0_20] : memref<8x128xf32, #tpu.memory_space<vmem>>, vector<1x128xf32>
    %cst_21 = arith.constant dense<0.000000e+00> : vector<1x128xf32>
    %31 = tpu.matmul %27, %7, %cst_21 {dimension_numbers = #tpu.dot_dimension_numbers<[1], [0], [0], [1], [0, 0, 1, 1], [], []>} : vector<1x32xf32>, vector<32x128xf32>, vector<1x128xf32> -> vector<1x128xf32>
    %32 = arith.addf %30, %31 : vector<1x128xf32>
    %33 = arith.negf %32 : vector<1x128xf32>
    %34 = math.exp %33 : vector<1x128xf32>
    %cst_22 = arith.constant 1.000000e+00 : f32
    %35 = vector.broadcast %cst_22 : f32 to vector<1x128xf32>
    %36 = arith.addf %35, %34 : vector<1x128xf32>
    %37 = arith.divf %35, %36 : vector<1x128xf32>
    %38 = math.tanh %32 : vector<1x128xf32>
    %39 = vector.extract_strided_slice %37 {offsets = [0, 0], sizes = [1, 32], strides = [1, 1]} : vector<1x128xf32> to vector<1x32xf32>
    %40 = vector.extract_strided_slice %37 {offsets = [0, 32], sizes = [1, 32], strides = [1, 1]} : vector<1x128xf32> to vector<1x32xf32>
    %41 = vector.extract_strided_slice %38 {offsets = [0, 64], sizes = [1, 32], strides = [1, 1]} : vector<1x128xf32> to vector<1x32xf32>
    %42 = vector.extract_strided_slice %37 {offsets = [0, 96], sizes = [1, 32], strides = [1, 1]} : vector<1x128xf32> to vector<1x32xf32>
    %43 = arith.mulf %40, %25 : vector<1x32xf32>
    %44 = arith.mulf %39, %41 : vector<1x32xf32>
    %45 = arith.addf %43, %44 : vector<1x32xf32>
    %46 = math.tanh %45 : vector<1x32xf32>
    %47 = arith.mulf %42, %46 : vector<1x32xf32>
    %c1_23 = arith.constant 1 : index
    %c0_24 = arith.constant 0 : index
    %48 = vector.load %arg11[%c1_23, %c0_24] : memref<8x32xf32, #tpu.memory_space<vmem>>, vector<1x32xf32>
    tpu.vector_store %arg11[%c1_23, %c0_24], %47 {strides = array<i32>} : memref<8x32xf32, #tpu.memory_space<vmem>>, vector<1x32xf32>,
    %c6 = arith.constant 6 : index
    %c0_25 = arith.constant 0 : index
    %49 = vector.load %arg12[%c6, %c0_25] : memref<8x32xf32, #tpu.memory_space<vmem>>, vector<1x32xf32>
    tpu.vector_store %arg12[%c6, %c0_25], %47 {strides = array<i32>} : memref<8x32xf32, #tpu.memory_space<vmem>>, vector<1x32xf32>,
    %c2 = arith.constant 2 : index
    %c0_26 = arith.constant 0 : index
    %50 = vector.load %arg10[%c2, %c0_26] : memref<8x128xf32, #tpu.memory_space<vmem>>, vector<1x128xf32>
    %cst_27 = arith.constant dense<0.000000e+00> : vector<1x128xf32>
    %51 = tpu.matmul %47, %7, %cst_27 {dimension_numbers = #tpu.dot_dimension_numbers<[1], [0], [0], [1], [0, 0, 1, 1], [], []>} : vector<1x32xf32>, vector<32x128xf32>, vector<1x128xf32> -> vector<1x128xf32>
    %52 = arith.addf %50, %51 : vector<1x128xf32>
    %53 = arith.negf %52 : vector<1x128xf32>
    %54 = math.exp %53 : vector<1x128xf32>
    %cst_28 = arith.constant 1.000000e+00 : f32
    %55 = vector.broadcast %cst_28 : f32 to vector<1x128xf32>
    %56 = arith.addf %55, %54 : vector<1x128xf32>
    %57 = arith.divf %55, %56 : vector<1x128xf32>
    %58 = math.tanh %52 : vector<1x128xf32>
    %59 = vector.extract_strided_slice %57 {offsets = [0, 0], sizes = [1, 32], strides = [1, 1]} : vector<1x128xf32> to vector<1x32xf32>
    %60 = vector.extract_strided_slice %57 {offsets = [0, 32], sizes = [1, 32], strides = [1, 1]} : vector<1x128xf32> to vector<1x32xf32>
    %61 = vector.extract_strided_slice %58 {offsets = [0, 64], sizes = [1, 32], strides = [1, 1]} : vector<1x128xf32> to vector<1x32xf32>
    %62 = vector.extract_strided_slice %57 {offsets = [0, 96], sizes = [1, 32], strides = [1, 1]} : vector<1x128xf32> to vector<1x32xf32>
    %63 = arith.mulf %60, %45 : vector<1x32xf32>
    %64 = arith.mulf %59, %61 : vector<1x32xf32>
    %65 = arith.addf %63, %64 : vector<1x32xf32>
    %66 = math.tanh %65 : vector<1x32xf32>
    %67 = arith.mulf %62, %66 : vector<1x32xf32>
    %c2_29 = arith.constant 2 : index
    %c0_30 = arith.constant 0 : index
    %68 = vector.load %arg11[%c2_29, %c0_30] : memref<8x32xf32, #tpu.memory_space<vmem>>, vector<1x32xf32>
    tpu.vector_store %arg11[%c2_29, %c0_30], %67 {strides = array<i32>} : memref<8x32xf32, #tpu.memory_space<vmem>>, vector<1x32xf32>,
    %c5 = arith.constant 5 : index
    %c0_31 = arith.constant 0 : index
    %69 = vector.load %arg12[%c5, %c0_31] : memref<8x32xf32, #tpu.memory_space<vmem>>, vector<1x32xf32>
    tpu.vector_store %arg12[%c5, %c0_31], %67 {strides = array<i32>} : memref<8x32xf32, #tpu.memory_space<vmem>>, vector<1x32xf32>,
    %c3 = arith.constant 3 : index
    %c0_32 = arith.constant 0 : index
    %70 = vector.load %arg10[%c3, %c0_32] : memref<8x128xf32, #tpu.memory_space<vmem>>, vector<1x128xf32>
    %cst_33 = arith.constant dense<0.000000e+00> : vector<1x128xf32>
    %71 = tpu.matmul %67, %7, %cst_33 {dimension_numbers = #tpu.dot_dimension_numbers<[1], [0], [0], [1], [0, 0, 1, 1], [], []>} : vector<1x32xf32>, vector<32x128xf32>, vector<1x128xf32> -> vector<1x128xf32>
    %72 = arith.addf %70, %71 : vector<1x128xf32>
    %73 = arith.negf %72 : vector<1x128xf32>
    %74 = math.exp %73 : vector<1x128xf32>
    %cst_34 = arith.constant 1.000000e+00 : f32
    %75 = vector.broadcast %cst_34 : f32 to vector<1x128xf32>
    %76 = arith.addf %75, %74 : vector<1x128xf32>
    %77 = arith.divf %75, %76 : vector<1x128xf32>
    %78 = math.tanh %72 : vector<1x128xf32>
    %79 = vector.extract_strided_slice %77 {offsets = [0, 0], sizes = [1, 32], strides = [1, 1]} : vector<1x128xf32> to vector<1x32xf32>
    %80 = vector.extract_strided_slice %77 {offsets = [0, 32], sizes = [1, 32], strides = [1, 1]} : vector<1x128xf32> to vector<1x32xf32>
    %81 = vector.extract_strided_slice %78 {offsets = [0, 64], sizes = [1, 32], strides = [1, 1]} : vector<1x128xf32> to vector<1x32xf32>
    %82 = vector.extract_strided_slice %77 {offsets = [0, 96], sizes = [1, 32], strides = [1, 1]} : vector<1x128xf32> to vector<1x32xf32>
    %83 = arith.mulf %80, %65 : vector<1x32xf32>
    %84 = arith.mulf %79, %81 : vector<1x32xf32>
    %85 = arith.addf %83, %84 : vector<1x32xf32>
    %86 = math.tanh %85 : vector<1x32xf32>
    %87 = arith.mulf %82, %86 : vector<1x32xf32>
    %c3_35 = arith.constant 3 : index
    %c0_36 = arith.constant 0 : index
    %88 = vector.load %arg11[%c3_35, %c0_36] : memref<8x32xf32, #tpu.memory_space<vmem>>, vector<1x32xf32>
    tpu.vector_store %arg11[%c3_35, %c0_36], %87 {strides = array<i32>} : memref<8x32xf32, #tpu.memory_space<vmem>>, vector<1x32xf32>,
    %c4 = arith.constant 4 : index
    %c0_37 = arith.constant 0 : index
    %89 = vector.load %arg12[%c4, %c0_37] : memref<8x32xf32, #tpu.memory_space<vmem>>, vector<1x32xf32>
    tpu.vector_store %arg12[%c4, %c0_37], %87 {strides = array<i32>} : memref<8x32xf32, #tpu.memory_space<vmem>>, vector<1x32xf32>,
    %c4_38 = arith.constant 4 : index
    %c0_39 = arith.constant 0 : index
    %90 = vector.load %arg10[%c4_38, %c0_39] : memref<8x128xf32, #tpu.memory_space<vmem>>, vector<1x128xf32>
    %cst_40 = arith.constant dense<0.000000e+00> : vector<1x128xf32>
    %91 = tpu.matmul %87, %7, %cst_40 {dimension_numbers = #tpu.dot_dimension_numbers<[1], [0], [0], [1], [0, 0, 1, 1], [], []>} : vector<1x32xf32>, vector<32x128xf32>, vector<1x128xf32> -> vector<1x128xf32>
    %92 = arith.addf %90, %91 : vector<1x128xf32>
    %93 = arith.negf %92 : vector<1x128xf32>
    %94 = math.exp %93 : vector<1x128xf32>
    %cst_41 = arith.constant 1.000000e+00 : f32
    %95 = vector.broadcast %cst_41 : f32 to vector<1x128xf32>
    %96 = arith.addf %95, %94 : vector<1x128xf32>
    %97 = arith.divf %95, %96 : vector<1x128xf32>
    %98 = math.tanh %92 : vector<1x128xf32>
    %99 = vector.extract_strided_slice %97 {offsets = [0, 0], sizes = [1, 32], strides = [1, 1]} : vector<1x128xf32> to vector<1x32xf32>
    %100 = vector.extract_strided_slice %97 {offsets = [0, 32], sizes = [1, 32], strides = [1, 1]} : vector<1x128xf32> to vector<1x32xf32>
    %101 = vector.extract_strided_slice %98 {offsets = [0, 64], sizes = [1, 32], strides = [1, 1]} : vector<1x128xf32> to vector<1x32xf32>
    %102 = vector.extract_strided_slice %97 {offsets = [0, 96], sizes = [1, 32], strides = [1, 1]} : vector<1x128xf32> to vector<1x32xf32>
    %103 = arith.mulf %100, %85 : vector<1x32xf32>
    %104 = arith.mulf %99, %101 : vector<1x32xf32>
    %105 = arith.addf %103, %104 : vector<1x32xf32>
    %106 = math.tanh %105 : vector<1x32xf32>
    %107 = arith.mulf %102, %106 : vector<1x32xf32>
    %c4_42 = arith.constant 4 : index
    %c0_43 = arith.constant 0 : index
    %108 = vector.load %arg11[%c4_42, %c0_43] : memref<8x32xf32, #tpu.memory_space<vmem>>, vector<1x32xf32>
    tpu.vector_store %arg11[%c4_42, %c0_43], %107 {strides = array<i32>} : memref<8x32xf32, #tpu.memory_space<vmem>>, vector<1x32xf32>,
    %c3_44 = arith.constant 3 : index
    %c0_45 = arith.constant 0 : index
    %109 = vector.load %arg12[%c3_44, %c0_45] : memref<8x32xf32, #tpu.memory_space<vmem>>, vector<1x32xf32>
    tpu.vector_store %arg12[%c3_44, %c0_45], %107 {strides = array<i32>} : memref<8x32xf32, #tpu.memory_space<vmem>>, vector<1x32xf32>,
    %c5_46 = arith.constant 5 : index
    %c0_47 = arith.constant 0 : index
    %110 = vector.load %arg10[%c5_46, %c0_47] : memref<8x128xf32, #tpu.memory_space<vmem>>, vector<1x128xf32>
    %cst_48 = arith.constant dense<0.000000e+00> : vector<1x128xf32>
    %111 = tpu.matmul %107, %7, %cst_48 {dimension_numbers = #tpu.dot_dimension_numbers<[1], [0], [0], [1], [0, 0, 1, 1], [], []>} : vector<1x32xf32>, vector<32x128xf32>, vector<1x128xf32> -> vector<1x128xf32>
    %112 = arith.addf %110, %111 : vector<1x128xf32>
    %113 = arith.negf %112 : vector<1x128xf32>
    %114 = math.exp %113 : vector<1x128xf32>
    %cst_49 = arith.constant 1.000000e+00 : f32
    %115 = vector.broadcast %cst_49 : f32 to vector<1x128xf32>
    %116 = arith.addf %115, %114 : vector<1x128xf32>
    %117 = arith.divf %115, %116 : vector<1x128xf32>
    %118 = math.tanh %112 : vector<1x128xf32>
    %119 = vector.extract_strided_slice %117 {offsets = [0, 0], sizes = [1, 32], strides = [1, 1]} : vector<1x128xf32> to vector<1x32xf32>
    %120 = vector.extract_strided_slice %117 {offsets = [0, 32], sizes = [1, 32], strides = [1, 1]} : vector<1x128xf32> to vector<1x32xf32>
    %121 = vector.extract_strided_slice %118 {offsets = [0, 64], sizes = [1, 32], strides = [1, 1]} : vector<1x128xf32> to vector<1x32xf32>
    %122 = vector.extract_strided_slice %117 {offsets = [0, 96], sizes = [1, 32], strides = [1, 1]} : vector<1x128xf32> to vector<1x32xf32>
    %123 = arith.mulf %120, %105 : vector<1x32xf32>
    %124 = arith.mulf %119, %121 : vector<1x32xf32>
    %125 = arith.addf %123, %124 : vector<1x32xf32>
    %126 = math.tanh %125 : vector<1x32xf32>
    %127 = arith.mulf %122, %126 : vector<1x32xf32>
    %c5_50 = arith.constant 5 : index
    %c0_51 = arith.constant 0 : index
    %128 = vector.load %arg11[%c5_50, %c0_51] : memref<8x32xf32, #tpu.memory_space<vmem>>, vector<1x32xf32>
    tpu.vector_store %arg11[%c5_50, %c0_51], %127 {strides = array<i32>} : memref<8x32xf32, #tpu.memory_space<vmem>>, vector<1x32xf32>,
    %c2_52 = arith.constant 2 : index
    %c0_53 = arith.constant 0 : index
    %129 = vector.load %arg12[%c2_52, %c0_53] : memref<8x32xf32, #tpu.memory_space<vmem>>, vector<1x32xf32>
    tpu.vector_store %arg12[%c2_52, %c0_53], %127 {strides = array<i32>} : memref<8x32xf32, #tpu.memory_space<vmem>>, vector<1x32xf32>,
    %c6_54 = arith.constant 6 : index
    %c0_55 = arith.constant 0 : index
    %130 = vector.load %arg10[%c6_54, %c0_55] : memref<8x128xf32, #tpu.memory_space<vmem>>, vector<1x128xf32>
    %cst_56 = arith.constant dense<0.000000e+00> : vector<1x128xf32>
    %131 = tpu.matmul %127, %7, %cst_56 {dimension_numbers = #tpu.dot_dimension_numbers<[1], [0], [0], [1], [0, 0, 1, 1], [], []>} : vector<1x32xf32>, vector<32x128xf32>, vector<1x128xf32> -> vector<1x128xf32>
    %132 = arith.addf %130, %131 : vector<1x128xf32>
    %133 = arith.negf %132 : vector<1x128xf32>
    %134 = math.exp %133 : vector<1x128xf32>
    %cst_57 = arith.constant 1.000000e+00 : f32
    %135 = vector.broadcast %cst_57 : f32 to vector<1x128xf32>
    %136 = arith.addf %135, %134 : vector<1x128xf32>
    %137 = arith.divf %135, %136 : vector<1x128xf32>
    %138 = math.tanh %132 : vector<1x128xf32>
    %139 = vector.extract_strided_slice %137 {offsets = [0, 0], sizes = [1, 32], strides = [1, 1]} : vector<1x128xf32> to vector<1x32xf32>
    %140 = vector.extract_strided_slice %137 {offsets = [0, 32], sizes = [1, 32], strides = [1, 1]} : vector<1x128xf32> to vector<1x32xf32>
    %141 = vector.extract_strided_slice %138 {offsets = [0, 64], sizes = [1, 32], strides = [1, 1]} : vector<1x128xf32> to vector<1x32xf32>
    %142 = vector.extract_strided_slice %137 {offsets = [0, 96], sizes = [1, 32], strides = [1, 1]} : vector<1x128xf32> to vector<1x32xf32>
    %143 = arith.mulf %140, %125 : vector<1x32xf32>
    %144 = arith.mulf %139, %141 : vector<1x32xf32>
    %145 = arith.addf %143, %144 : vector<1x32xf32>
    %146 = math.tanh %145 : vector<1x32xf32>
    %147 = arith.mulf %142, %146 : vector<1x32xf32>
    %c6_58 = arith.constant 6 : index
    %c0_59 = arith.constant 0 : index
    %148 = vector.load %arg11[%c6_58, %c0_59] : memref<8x32xf32, #tpu.memory_space<vmem>>, vector<1x32xf32>
    tpu.vector_store %arg11[%c6_58, %c0_59], %147 {strides = array<i32>} : memref<8x32xf32, #tpu.memory_space<vmem>>, vector<1x32xf32>,
    %c1_60 = arith.constant 1 : index
    %c0_61 = arith.constant 0 : index
    %149 = vector.load %arg12[%c1_60, %c0_61] : memref<8x32xf32, #tpu.memory_space<vmem>>, vector<1x32xf32>
    tpu.vector_store %arg12[%c1_60, %c0_61], %147 {strides = array<i32>} : memref<8x32xf32, #tpu.memory_space<vmem>>, vector<1x32xf32>,
    %c7_62 = arith.constant 7 : index
    %c0_63 = arith.constant 0 : index
    %150 = vector.load %arg10[%c7_62, %c0_63] : memref<8x128xf32, #tpu.memory_space<vmem>>, vector<1x128xf32>
    %cst_64 = arith.constant dense<0.000000e+00> : vector<1x128xf32>
    %151 = tpu.matmul %147, %7, %cst_64 {dimension_numbers = #tpu.dot_dimension_numbers<[1], [0], [0], [1], [0, 0, 1, 1], [], []>} : vector<1x32xf32>, vector<32x128xf32>, vector<1x128xf32> -> vector<1x128xf32>
    %152 = arith.addf %150, %151 : vector<1x128xf32>
    %153 = arith.negf %152 : vector<1x128xf32>
    %154 = math.exp %153 : vector<1x128xf32>
    %cst_65 = arith.constant 1.000000e+00 : f32
    %155 = vector.broadcast %cst_65 : f32 to vector<1x128xf32>
    %156 = arith.addf %155, %154 : vector<1x128xf32>
    %157 = arith.divf %155, %156 : vector<1x128xf32>
    %158 = math.tanh %152 : vector<1x128xf32>
    %159 = vector.extract_strided_slice %157 {offsets = [0, 0], sizes = [1, 32], strides = [1, 1]} : vector<1x128xf32> to vector<1x32xf32>
    %160 = vector.extract_strided_slice %157 {offsets = [0, 32], sizes = [1, 32], strides = [1, 1]} : vector<1x128xf32> to vector<1x32xf32>
    %161 = vector.extract_strided_slice %158 {offsets = [0, 64], sizes = [1, 32], strides = [1, 1]} : vector<1x128xf32> to vector<1x32xf32>
    %162 = vector.extract_strided_slice %157 {offsets = [0, 96], sizes = [1, 32], strides = [1, 1]} : vector<1x128xf32> to vector<1x32xf32>
    %163 = arith.mulf %160, %145 : vector<1x32xf32>
    %164 = arith.mulf %159, %161 : vector<1x32xf32>
    %165 = arith.addf %163, %164 : vector<1x32xf32>
    %166 = math.tanh %165 : vector<1x32xf32>
    %167 = arith.mulf %162, %166 : vector<1x32xf32>
    %c7_66 = arith.constant 7 : index
    %c0_67 = arith.constant 0 : index
    %168 = vector.load %arg11[%c7_66, %c0_67] : memref<8x32xf32, #tpu.memory_space<vmem>>, vector<1x32xf32>
    tpu.vector_store %arg11[%c7_66, %c0_67], %167 {strides = array<i32>} : memref<8x32xf32, #tpu.memory_space<vmem>>, vector<1x32xf32>,
    %c0_68 = arith.constant 0 : index
    %c0_69 = arith.constant 0 : index
    %169 = vector.load %arg12[%c0_68, %c0_69] : memref<8x32xf32, #tpu.memory_space<vmem>>, vector<1x32xf32>
    tpu.vector_store %arg12[%c0_68, %c0_69], %167 {strides = array<i32>} : memref<8x32xf32, #tpu.memory_space<vmem>>, vector<1x32xf32>,
    %c0_70 = arith.constant 0 : index
    %c0_71 = arith.constant 0 : index
    %170 = vector.load %arg11[%c0_70, %c0_71] : memref<8x32xf32, #tpu.memory_space<vmem>>, vector<8x32xf32>
    %c0_72 = arith.constant 0 : index
    %c0_73 = arith.constant 0 : index
    %171 = vector.load %arg6[%c0_72, %c0_73] : memref<32x128xf32, #tpu.memory_space<vmem>>, vector<32x128xf32>
    %cst_74 = arith.constant dense<0.000000e+00> : vector<8x128xf32>
    %172 = tpu.matmul %170, %171, %cst_74 {dimension_numbers = #tpu.dot_dimension_numbers<[1], [0], [0], [1], [0, 0, 1, 1], [], []>} : vector<8x32xf32>, vector<32x128xf32>, vector<8x128xf32> -> vector<8x128xf32>
    %c0_75 = arith.constant 0 : index
    %c0_76 = arith.constant 0 : index
    %173 = vector.load %arg12[%c0_75, %c0_76] : memref<8x32xf32, #tpu.memory_space<vmem>>, vector<8x32xf32>
    %c0_77 = arith.constant 0 : index
    %c0_78 = arith.constant 0 : index
    %174 = vector.load %arg7[%c0_77, %c0_78] : memref<32x128xf32, #tpu.memory_space<vmem>>, vector<32x128xf32>
    %cst_79 = arith.constant dense<0.000000e+00> : vector<8x128xf32>
    %175 = tpu.matmul %173, %174, %cst_79 {dimension_numbers = #tpu.dot_dimension_numbers<[1], [0], [0], [1], [0, 0, 1, 1], [], []>} : vector<8x32xf32>, vector<32x128xf32>, vector<8x128xf32> -> vector<8x128xf32>
    %176 = arith.addf %172, %175 : vector<8x128xf32>
    %c0_80 = arith.constant 0 : index
    %c0_81 = arith.constant 0 : index
    %177 = vector.load %arg8[%c0_80, %c0_81] : memref<1x128xf32, #tpu.memory_space<vmem>>, vector<1x128xf32>
    %178 = vector.broadcast %177 : vector<1x128xf32> to vector<8x128xf32>
    %179 = arith.addf %176, %178 : vector<8x128xf32>
    %cst_82 = arith.constant dense<0xFF800000> : vector<8xf32>
    %180 = vector.multi_reduction <maximumf>, %179, %cst_82 [1] : vector<8x128xf32> to vector<8xf32>
    %181 = vector.shape_cast %180 : vector<8xf32> to vector<8x1xf32>
    %182 = vector.broadcast %181 : vector<8x1xf32> to vector<8x128xf32>
    %183 = arith.subf %179, %182 : vector<8x128xf32>
    %184 = math.exp %183 : vector<8x128xf32>
    %cst_83 = arith.constant dense<0.000000e+00> : vector<8xf32>
    %185 = vector.multi_reduction <add>, %184, %cst_83 [1] : vector<8x128xf32> to vector<8xf32>
    %186 = vector.shape_cast %185 : vector<8xf32> to vector<8x1xf32>
    %187 = vector.broadcast %186 : vector<8x1xf32> to vector<8x128xf32>
    %188 = arith.divf %184, %187 : vector<8x128xf32>
    %c0_84 = arith.constant 0 : index
    %c0_85 = arith.constant 0 : index
    %189 = vector.load %arg9[%c0_84, %c0_85] : memref<8x128xf32, #tpu.memory_space<vmem>>, vector<8x128xf32>
    tpu.vector_store %arg9[%c0_84, %c0_85], %188 {strides = array<i32>} : memref<8x128xf32, #tpu.memory_space<vmem>>, vector<8x128xf32>,
    return
  }
}

</mosaic_0001>

<bundles_post_ra>
// kernel: tpu_custom_call.1
= control target key start
LH: loop header
LB: loop body
LE: loop exit
PB: predicated region body
PF: predicated region fallthrough
CT: control target
= control target key end

     0   :  { %14 = vsyncpa [#allocation6], 0  ;;  %s1197_s0 = inlined_call_operand.hbm [shape: f32[8,32], index: 0, kind: input, shape index: {}]   ;;  %s1198_s1 = inlined_call_operand.hbm [shape: f32[32,128], index: 1, kind: input, shape index: {}]   ;;  %s1199_s2 = inlined_call_operand.vmem [shape: f32[1,128], index: 2, kind: input, shape index: {}]   ;;  %s1200_s3 = inlined_call_operand.hbm [shape: f32[32,128], index: 3, kind: input, shape index: {}]   ;;  %s1201_s4 = inlined_call_operand.vmem [shape: f32[1,32], index: 4, kind: input, shape index: {}]   ;;  %s1202_s5 = inlined_call_operand.vmem [shape: f32[1,32], index: 5, kind: input, shape index: {}]   ;;  %s1203_s6 = inlined_call_operand.hbm [shape: f32[32,128], index: 6, kind: input, shape index: {}]   ;;  %s1204_s7 = inlined_call_operand.hbm [shape: f32[32,128], index: 7, kind: input, shape index: {}]   ;;  %s1205_s8 = inlined_call_operand.vmem [shape: f32[1,128], index: 8, kind: input, shape index: {}]   ;;  %s1206_s9 = inlined_call_operand.hbm [shape: f32[8,128], index: 9, kind: output, shape index: {}]  }
   0x1   :  { %15 = vsyncpa [#allocation9], 0 }
   0x2   :  { %16 = vsyncpa [#allocation12], 0  ;;  %s33_s11 = sshll.u32 %s1198_s1, 4  ;;  %s34_s11 = int_to_ptr.hbm [resolvable:$true] %s33_s11 }
   0x3   :  { %17 = vsyncpa [#allocation7], 0  ;;  %s1047_s12 = smov [#allocation8]   ;;  %s65_s16 = sshll.u32 %s1203_s6, 4  ;;  %s66_s16 = int_to_ptr.hbm [resolvable:$true] %s65_s16 }
   0x4   :  { %s35_s13 = sshll.u32 %s1047_s12, 4  ;;  %s1048_s17 = smov 128   ;;  %s36_s13 = int_to_ptr.vmem [resolvable:$true] %s35_s13 }
   0x5   :  { %s1049_s18 = smov 8   ;;  %s1050_s19 = smov [#allocation11]  }
   0x6   :  { %41 = dma.hbm_to_vmem [thread:$0]  %s34_s11, 512, %s36_s13, [#allocation9], %s1048_s17, %s1048_s17, %s1049_s18  }
   0x7   :  { %s67_s20 = sshll.u32 %s1050_s19, 4  ;;  %s23_s23 = sshll.u32 %s1197_s0, 4  ;;  %s68_s20 = int_to_ptr.vmem [resolvable:$true] %s67_s20  ;;  %s24_s23 = int_to_ptr.hbm [resolvable:$true] %s23_s23 }
   0x8   :  { %73 = dma.hbm_to_vmem [thread:$0]  %s66_s16, 512, %s68_s20, [#allocation12], %s1048_s17, %s1048_s17, %s1049_s18  }
   0x9   :  { %s48_s25 = sshll.u32 %s1200_s3, 4  ;;  %s1051_s26 = smov [#allocation5]   ;;  %s49_s25 = int_to_ptr.hbm [resolvable:$true] %s48_s25 }
   0xa   :  { %s25_s27 = sshll.u32 %s1051_s26, 4  ;;  %s1052_s6 = smov [#allocation10]   ;;  %s26_s27 = int_to_ptr.vmem [resolvable:$true] %s25_s27 }
   0xb   :  { %28 = dma.hbm_to_vmem [thread:$0]  %s24_s23, 128, %s26_s27, [#allocation6]  }
   0xc   :  { %s50_s28 = sshll.u32 %s1052_s6, 4  ;;  %s78_s10 = sshll.u32 %s1204_s7, 4  ;;  %s51_s28 = int_to_ptr.vmem [resolvable:$true] %s50_s28  ;;  %s79_s10 = int_to_ptr.hbm [resolvable:$true] %s78_s10 }
   0xd   :  { %56 = dma.hbm_to_vmem [thread:$0]  %s49_s25, 512, %s51_s28, [#allocation9], %s1048_s17, %s1048_s17, %s1049_s18  }
   0xe   :  { %s1053_s0 = smov [#allocation13]  }
   0xf   :  { %s80_s11 = sshll.u32 %s1053_s0, 4  ;;  %s81_s11 = int_to_ptr.vmem [resolvable:$true] %s80_s11 }
  0x10   :  { %86 = dma.hbm_to_vmem [thread:$0]  %s79_s10, 512, %s81_s11, [#allocation12], %s1048_s17, %s1048_s17, %s1049_s18  }
  0x11   :  { %1039 = dma.done.wait [#allocation6], 128  }
  0x12   :  { %1040 = vsyncadd [#allocation6], 4294967168 }
  0x13   :  { %1041 = dma.done.wait [#allocation9], 1024  }
  0x14   :  { %1042 = vsyncadd [#allocation9], 4294966272 }
  0x15   :  { %1043 = dma.done.wait [#allocation12], 1024  }
  0x16   :  { %1044 = vsyncadd [#allocation12], 4294966272  ;;  %v113_v0 = vld [vmem:[#allocation8 + $0x18] sm:$0xff]  ;;  %v112_v1 = vld [vmem:[#allocation8 + $0x10] sm:$0xff]  ;;  %vm118_vm0 = vcmask 261120   ;;  %s1054_s13 = smov 64  }
  0x17   :  { %134 = vmatpush.msra.mxu0 %v113_v0  ;;  %v146_v2 = vld [vmem:[#allocation10 + $0x18] sm:$0xff]  ;;  %v111_v3 = vld [vmem:[#allocation8 + $0x8] sm:$0xff]  ;;  %v145_v4 = vld [vmem:[#allocation10 + $0x10] sm:$0xff]  ;;  %s1055_s16 = smov 32   ;;  %vm220_vm5 = vcmask 253952   ;;  %s783_s20 = sshll.u32 %s1206_s9, 4  ;;  %s784_s20 = int_to_ptr.hbm [resolvable:$true] %s783_s20 }
  0x18   :  { %165 = vmatpush.msra.mxu1 %v146_v2  ;;  %238 = vmatpush.msra.mxu2 %v146_v2  ;;  %v144_v5 = vld [vmem:[#allocation10 + $0x8] sm:$0xff]  ;;  %v110_v6 = vld [vmem:[#allocation8] sm:$0xff]  ;;  %v109_v7 = vld [vmem:[#allocation5] sm:$0xff] }
  0x19   :  { %135 = vmatpush.msra.mxu0 %v112_v1  ;;  %305 = vmatpush.msra.mxu3 %v146_v2  ;;  %v143_v8 = vld [vmem:[#allocation10] sm:$0xff] }
  0x1a   :  { %166 = vmatpush.msra.mxu1 %v145_v4  ;;  %239 = vmatpush.msra.mxu2 %v145_v4  ;;  %v147_v9 = vld [vmem:[%s1201_s4] sm:$0x1] }
  0x1b   :  { %136 = vmatpush.msra.mxu0 %v111_v3  ;;  %306 = vmatpush.msra.mxu3 %v145_v4  ;;  %v824_v10 = vld [vmem:[%s1199_s2] ss:$0 sm:$0xff] }
  0x1c   :  { %167 = vmatpush.msra.mxu1 %v144_v5  ;;  %240 = vmatpush.msra.mxu2 %v144_v5  ;;  %v825_v17 = vld [vmem:[%s1202_s5] ss:$0 sm:$0xff] }
  0x1d   :  { %137 = vmatpush.msra.mxu0 %v110_v6  ;;  %307 = vmatpush.msra.mxu3 %v144_v5 }
  0x1e   :  { %795 = vmatmul.msk.f32.vlgmr.msra.gmra.mxu0 %vm118_vm0, %v109_v7  ;;  %168 = vmatpush.msra.mxu1 %v143_v8 }
  0x1f   :  { %796 = vmatmul.msk.f32.vlgmr.msra.gmra.mxu1 %vm118_vm0, %v147_v9  ;;  %241 = vmatpush.msra.mxu2 %v143_v8 }
  0x20   :  { %308 = vmatpush.msra.mxu3 %v143_v8  ;;  %372 = vmatpush.msrb.mxu0 %v146_v2 }
  0x21   :  { %439 = vmatpush.msrb.mxu1 %v146_v2  ;;  %506 = vmatpush.msrb.mxu2 %v146_v2 }
  0x22   :  { %373 = vmatpush.msrb.mxu0 %v145_v4  ;;  %573 = vmatpush.msrb.mxu3 %v146_v2 }
  0x23   :  { %440 = vmatpush.msrb.mxu1 %v145_v4  ;;  %507 = vmatpush.msrb.mxu2 %v145_v4 }
  0x24   :  { %374 = vmatpush.msrb.mxu0 %v144_v5  ;;  %574 = vmatpush.msrb.mxu3 %v145_v4 }
  0x25   :  { %441 = vmatpush.msrb.mxu1 %v144_v5  ;;  %508 = vmatpush.msrb.mxu2 %v144_v5 }
  0x26   :  { %375 = vmatpush.msrb.mxu0 %v143_v8  ;;  %575 = vmatpush.msrb.mxu3 %v144_v5 }
  0x27   :  { %442 = vmatpush.msrb.mxu1 %v143_v8  ;;  %509 = vmatpush.msrb.mxu2 %v143_v8 }
  0x28   :  { %576 = vmatpush.msrb.mxu3 %v143_v8  ;;  %640 = vmatpush.msra.mxu0 %v146_v2 }
  0x2a   :  { %641 = vmatpush.msra.mxu0 %v145_v4 }
  0x2c   :  { %642 = vmatpush.msra.mxu0 %v144_v5 }
  0x2e   :  { %643 = vmatpush.msra.mxu0 %v143_v8 }
  0x9b   :  { %v139_v11 = vpop.f32.mrf.mxu0 }
  0x9c   :  { %v140_v12 = vadd.f32 %v824_v10, %v139_v11  ;;  %v170_v13 = vpop.f32.mrf.mxu1 }
  0x9e   :  { %142 = vst [vmem:[#allocation2] sm:$0xff] %v140_v12 }
  0xa5   :  { %v149_v14 = vld [vmem:[#allocation2] sm:$0x1]  ;;  %v223_v41 = vld [vmem:[#allocation2 + $0x1] sm:$0x1]  ;;  %v290_v3 = vld [vmem:[#allocation2 + $0x2] sm:$0x1] }
  0xa6   :  { %v173_v15 = vadd.f32 %v170_v13, %v149_v14 }
  0xa8   :  { %827 = vtanh.f32 %v173_v15  ;;  %v797_v18 = vmul.f32 -1.442695, %v173_v15 }
  0xaa   :  { %829 = vpow2.f32 %v797_v18 }
  0xae   :  { %v828_v16 = vpop.eup %827 }
  0xaf   :  { %201 = vrot.lane.b32.xlu0 %v828_v16, %s1054_s13 }
  0xb0   :  { %v830_v19 = vpop.eup %829 }
  0xb1   :  { %v177_v20 = vadd.f32 1.0, %v830_v19 }
  0xb3   :  { %831 = vrcp.f32 %v177_v20  ;;  %v189_v26 = vand.u32 2147483648, %v177_v20  ;;  %vm183_vm2 = vweird.f32 %v177_v20  ;;  %v187_v27 = vand.u32 2147483647, %v177_v20 }
  0xb5   :  { %v190_v29 = vor.u32 1.1754944e-38, %v189_v26  ;;  %vm188_vm4 = vcmp.eq.f32.partialorder %v187_v27, 8.507059e+37 }
  0xb7   :  { %196 = vrot.lane.b32.xlu0 %v825_v17, %s1055_s16 }
  0xb9   :  { %v832_v21 = vpop.eup %831 }
  0xba   :  { %v179_v22 = vmul.f32 %v832_v21, %v177_v20  ;;  %vm184_vm1 = vweird.f32 %v832_v21 }
  0xbb   :  { %vm185_vm3 = vmor %vm183_vm2, %vm184_vm1 }
  0xbc   :  { %v180_v23 = vsub.f32 1.0, %v179_v22 }
  0xbe   :  { %v181_v24 = vmul.f32 %v832_v21, %v180_v23 }
  0xc0   :  { %v182_v25 = vadd.f32 %v832_v21, %v181_v24 }
  0xc2   :  { %v186_v28 = vsel %vm185_vm3, %v832_v21, %v182_v25 }
  0xc3   :  { %v191_v31 = vsel %vm188_vm4, %v190_v29, %v186_v28  ;;  %v357_v29 = vld [vmem:[#allocation2 + $0x3] sm:$0x1] }
 0x121   :  { %v202_v30 = vpop.permute.xlu0 %201 }
 0x122   :  { %v204_v32 = vmul.f32 %v202_v30, %v191_v31 }
 0x124   :  { %206 = vrot.lane.b32.xlu1 %v204_v32, %s1055_s16 }
 0x129   :  { %v197_v33 = vpop.permute.xlu0 %196 }
 0x12a   :  { %v199_v34 = vmul.f32 %v197_v33, %v191_v31 }
 0x196   :  { %v207_v35 = vpop.permute.xlu1 %206 }
 0x197   :  { %v209_v36 = vadd.f32 %v207_v35, %v199_v34 }
 0x199   :  { %833 = vtanh.f32 %v209_v36 }
 0x19f   :  { %v834_v37 = vpop.eup %833 }
 0x1a0   :  { %212 = vrot.lane.b32.xlu1 %v834_v37, %s1054_s13 }
 0x212   :  { %v213_v38 = vpop.permute.xlu1 %212 }
 0x213   :  { %v215_v39 = vmul.f32 %v213_v38, %v191_v31 }
 0x215   :  { %217 = vrot.lane.b32.xlu2 %v215_v39, %s1055_s16 }
 0x26f   :  { %v218_v40 = vpop.permute.xlu2 %217 }
 0x270   :  { %221 = vst.msk [vmem:[#allocation3] sm:$0x1] %vm220_vm5, %v218_v40  ;;  %798 = vmatmul.msk.f32.vlgmr.msra.gmra.mxu2 %vm118_vm0, %v218_v40 }
 0x271   :  { %222 = vst.msk [vmem:[#allocation4 + $0x7] sm:$0x1] %vm220_vm5, %v218_v40 }
 0x2f3   :  { %v243_v42 = vpop.f32.mrf.mxu2 }
 0x2f4   :  { %v246_v43 = vadd.f32 %v243_v42, %v223_v41 }
 0x2f6   :  { %835 = vtanh.f32 %v246_v43  ;;  %v799_v45 = vmul.f32 -1.442695, %v246_v43 }
 0x2f8   :  { %837 = vpow2.f32 %v799_v45 }
 0x2fc   :  { %v836_v44 = vpop.eup %835 }
 0x2fd   :  { %269 = vrot.lane.b32.xlu2 %v836_v44, %s1054_s13 }
 0x2fe   :  { %v838_v46 = vpop.eup %837 }
 0x2ff   :  { %v250_v47 = vadd.f32 1.0, %v838_v46 }
 0x301   :  { %839 = vrcp.f32 %v250_v47  ;;  %v262_v53 = vand.u32 2147483648, %v250_v47  ;;  %vm256_vm7 = vweird.f32 %v250_v47  ;;  %v260_v54 = vand.u32 2147483647, %v250_v47 }
 0x303   :  { %v263_v56 = vor.u32 1.1754944e-38, %v262_v53  ;;  %vm261_vm9 = vcmp.eq.f32.partialorder %v260_v54, 8.507059e+37 }
 0x307   :  { %v840_v48 = vpop.eup %839 }
 0x308   :  { %v252_v49 = vmul.f32 %v840_v48, %v250_v47  ;;  %vm257_vm6 = vweird.f32 %v840_v48 }
 0x309   :  { %vm258_vm8 = vmor %vm256_vm7, %vm257_vm6 }
 0x30a   :  { %v253_v50 = vsub.f32 1.0, %v252_v49 }
 0x30c   :  { %v254_v51 = vmul.f32 %v840_v48, %v253_v50 }
 0x30e   :  { %v255_v52 = vadd.f32 %v840_v48, %v254_v51 }
 0x310   :  { %v259_v55 = vsel %vm258_vm8, %v840_v48, %v255_v52 }
 0x311   :  { %v264_v58 = vsel %vm261_vm9, %v263_v56, %v259_v55  ;;  %v424_v55 = vld [vmem:[#allocation2 + $0x4] sm:$0x1] }
 0x312   :  { %v267_v60 = vmul.f32 %v264_v58, %v209_v36 }
 0x357   :  { %v270_v57 = vpop.permute.xlu2 %269 }
 0x358   :  { %v272_v59 = vmul.f32 %v270_v57, %v264_v58 }
 0x35a   :  { %274 = vrot.lane.b32.xlu0 %v272_v59, %s1055_s16 }
 0x3cc   :  { %v275_v61 = vpop.permute.xlu0 %274 }
 0x3cd   :  { %v277_v62 = vadd.f32 %v275_v61, %v267_v60 }
 0x3cf   :  { %841 = vtanh.f32 %v277_v62 }
 0x3d5   :  { %v842_v63 = vpop.eup %841 }
 0x3d6   :  { %280 = vrot.lane.b32.xlu1 %v842_v63, %s1054_s13 }
 0x448   :  { %v281_v0 = vpop.permute.xlu1 %280 }
 0x449   :  { %v283_v1 = vmul.f32 %v281_v0, %v264_v58 }
 0x44b   :  { %285 = vrot.lane.b32.xlu2 %v283_v1, %s1055_s16 }
 0x4a5   :  { %v286_v2 = vpop.permute.xlu2 %285 }
 0x4a6   :  { %288 = vst.msk [vmem:[#allocation3 + $0x1] sm:$0x1] %vm220_vm5, %v286_v2  ;;  %800 = vmatmul.msk.f32.vlgmr.msra.gmra.mxu3 %vm118_vm0, %v286_v2 }
 0x4a7   :  { %289 = vst.msk [vmem:[#allocation4 + $0x6] sm:$0x1] %vm220_vm5, %v286_v2 }
 0x529   :  { %v310_v4 = vpop.f32.mrf.mxu3 }
 0x52a   :  { %v313_v5 = vadd.f32 %v310_v4, %v290_v3 }
 0x52c   :  { %843 = vtanh.f32 %v313_v5  ;;  %v801_v7 = vmul.f32 -1.442695, %v313_v5 }
 0x52e   :  { %845 = vpow2.f32 %v801_v7 }
 0x532   :  { %v844_v6 = vpop.eup %843 }
 0x533   :  { %336 = vrot.lane.b32.xlu0 %v844_v6, %s1054_s13 }
 0x534   :  { %v846_v8 = vpop.eup %845 }
 0x535   :  { %v317_v9 = vadd.f32 1.0, %v846_v8 }
 0x537   :  { %847 = vrcp.f32 %v317_v9  ;;  %v329_v15 = vand.u32 2147483648, %v317_v9  ;;  %vm323_vm11 = vweird.f32 %v317_v9  ;;  %v327_v16 = vand.u32 2147483647, %v317_v9 }
 0x539   :  { %v330_v18 = vor.u32 1.1754944e-38, %v329_v15  ;;  %vm328_vm13 = vcmp.eq.f32.partialorder %v327_v16, 8.507059e+37 }
 0x53d   :  { %v848_v10 = vpop.eup %847 }
 0x53e   :  { %v319_v11 = vmul.f32 %v848_v10, %v317_v9  ;;  %vm324_vm10 = vweird.f32 %v848_v10 }
 0x53f   :  { %vm325_vm12 = vmor %vm323_vm11, %vm324_vm10 }
 0x540   :  { %v320_v12 = vsub.f32 1.0, %v319_v11 }
 0x542   :  { %v321_v13 = vmul.f32 %v848_v10, %v320_v12 }
 0x544   :  { %v322_v14 = vadd.f32 %v848_v10, %v321_v13 }
 0x546   :  { %v326_v17 = vsel %vm325_vm12, %v848_v10, %v322_v14 }
 0x547   :  { %v331_v20 = vsel %vm328_vm13, %v330_v18, %v326_v17  ;;  %v491_v17 = vld [vmem:[#allocation2 + $0x5] sm:$0x1] }
 0x548   :  { %v334_v22 = vmul.f32 %v331_v20, %v277_v62 }
 0x5a5   :  { %v337_v19 = vpop.permute.xlu0 %336 }
 0x5a6   :  { %v339_v21 = vmul.f32 %v337_v19, %v331_v20 }
 0x5a8   :  { %341 = vrot.lane.b32.xlu1 %v339_v21, %s1055_s16 }
 0x61a   :  { %v342_v23 = vpop.permute.xlu1 %341 }
 0x61b   :  { %v344_v24 = vadd.f32 %v342_v23, %v334_v22 }
 0x61d   :  { %849 = vtanh.f32 %v344_v24 }
 0x623   :  { %v850_v25 = vpop.eup %849 }
 0x624   :  { %347 = vrot.lane.b32.xlu2 %v850_v25, %s1054_s13 }
 0x67e   :  { %v348_v26 = vpop.permute.xlu2 %347 }
 0x67f   :  { %v350_v27 = vmul.f32 %v348_v26, %v331_v20 }
 0x681   :  { %352 = vrot.lane.b32.xlu0 %v350_v27, %s1055_s16 }
 0x6f3   :  { %v353_v28 = vpop.permute.xlu0 %352 }
 0x6f4   :  { %355 = vst.msk [vmem:[#allocation3 + $0x2] sm:$0x1] %vm220_vm5, %v353_v28  ;;  %802 = vmatmul.msk.f32.vlgmr.msrb.gmra.mxu0 %vm118_vm0, %v353_v28 }
 0x6f5   :  { %356 = vst.msk [vmem:[#allocation4 + $0x5] sm:$0x1] %vm220_vm5, %v353_v28 }
 0x771   :  { %v377_v30 = vpop.f32.mrf.mxu0 }
 0x772   :  { %v380_v31 = vadd.f32 %v377_v30, %v357_v29 }
 0x774   :  { %851 = vtanh.f32 %v380_v31  ;;  %v803_v33 = vmul.f32 -1.442695, %v380_v31 }
 0x776   :  { %853 = vpow2.f32 %v803_v33 }
 0x77a   :  { %v852_v32 = vpop.eup %851 }
 0x77b   :  { %403 = vrot.lane.b32.xlu1 %v852_v32, %s1054_s13 }
 0x77c   :  { %v854_v34 = vpop.eup %853 }
 0x77d   :  { %v384_v35 = vadd.f32 1.0, %v854_v34 }
 0x77f   :  { %855 = vrcp.f32 %v384_v35  ;;  %v396_v41 = vand.u32 2147483648, %v384_v35  ;;  %vm390_vm15 = vweird.f32 %v384_v35  ;;  %v394_v42 = vand.u32 2147483647, %v384_v35 }
 0x781   :  { %v397_v44 = vor.u32 1.1754944e-38, %v396_v41  ;;  %vm395_vm2 = vcmp.eq.f32.partialorder %v394_v42, 8.507059e+37 }
 0x785   :  { %v856_v36 = vpop.eup %855 }
 0x786   :  { %v386_v37 = vmul.f32 %v856_v36, %v384_v35  ;;  %vm391_vm14 = vweird.f32 %v856_v36 }
 0x787   :  { %vm392_vm1 = vmor %vm390_vm15, %vm391_vm14 }
 0x788   :  { %v387_v38 = vsub.f32 1.0, %v386_v37 }
 0x78a   :  { %v388_v39 = vmul.f32 %v856_v36, %v387_v38 }
 0x78c   :  { %v389_v40 = vadd.f32 %v856_v36, %v388_v39 }
 0x78e   :  { %v393_v43 = vsel %vm392_vm1, %v856_v36, %v389_v40 }
 0x78f   :  { %v398_v46 = vsel %vm395_vm2, %v397_v44, %v393_v43  ;;  %v558_v43 = vld [vmem:[#allocation2 + $0x6] sm:$0x1] }
 0x790   :  { %v401_v48 = vmul.f32 %v398_v46, %v344_v24 }
 0x7ed   :  { %v404_v45 = vpop.permute.xlu1 %403 }
 0x7ee   :  { %v406_v47 = vmul.f32 %v404_v45, %v398_v46 }
 0x7f0   :  { %408 = vrot.lane.b32.xlu2 %v406_v47, %s1055_s16 }
 0x84a   :  { %v409_v49 = vpop.permute.xlu2 %408 }
 0x84b   :  { %v411_v50 = vadd.f32 %v409_v49, %v401_v48 }
 0x84d   :  { %857 = vtanh.f32 %v411_v50 }
 0x853   :  { %v858_v51 = vpop.eup %857 }
 0x854   :  { %414 = vrot.lane.b32.xlu0 %v858_v51, %s1054_s13 }
 0x8c6   :  { %v415_v52 = vpop.permute.xlu0 %414 }
 0x8c7   :  { %v417_v53 = vmul.f32 %v415_v52, %v398_v46 }
 0x8c9   :  { %419 = vrot.lane.b32.xlu1 %v417_v53, %s1055_s16 }
 0x93b   :  { %v420_v54 = vpop.permute.xlu1 %419 }
 0x93c   :  { %422 = vst.msk [vmem:[#allocation3 + $0x3] sm:$0x1] %vm220_vm5, %v420_v54  ;;  %804 = vmatmul.msk.f32.vlgmr.msrb.gmra.mxu1 %vm118_vm0, %v420_v54 }
 0x93d   :  { %423 = vst.msk [vmem:[#allocation4 + $0x4] sm:$0x1] %vm220_vm5, %v420_v54 }
 0x9b9   :  { %v444_v56 = vpop.f32.mrf.mxu1 }
 0x9ba   :  { %v447_v57 = vadd.f32 %v444_v56, %v424_v55 }
 0x9bc   :  { %859 = vtanh.f32 %v447_v57  ;;  %v805_v59 = vmul.f32 -1.442695, %v447_v57 }
 0x9be   :  { %861 = vpow2.f32 %v805_v59 }
 0x9c2   :  { %v860_v58 = vpop.eup %859 }
 0x9c3   :  { %470 = vrot.lane.b32.xlu2 %v860_v58, %s1054_s13 }
 0x9c4   :  { %v862_v60 = vpop.eup %861 }
 0x9c5   :  { %v451_v61 = vadd.f32 1.0, %v862_v60 }
 0x9c7   :  { %863 = vrcp.f32 %v451_v61  ;;  %v463_v3 = vand.u32 2147483648, %v451_v61  ;;  %vm457_vm4 = vweird.f32 %v451_v61  ;;  %v461_v4 = vand.u32 2147483647, %v451_v61 }
 0x9c9   :  { %v464_v6 = vor.u32 1.1754944e-38, %v463_v3  ;;  %vm462_vm7 = vcmp.eq.f32.partialorder %v461_v4, 8.507059e+37 }
 0x9cd   :  { %v864_v62 = vpop.eup %863 }
 0x9ce   :  { %v453_v63 = vmul.f32 %v864_v62, %v451_v61  ;;  %vm458_vm3 = vweird.f32 %v864_v62 }
 0x9cf   :  { %vm459_vm6 = vmor %vm457_vm4, %vm458_vm3 }
 0x9d0   :  { %v454_v0 = vsub.f32 1.0, %v453_v63 }
 0x9d2   :  { %v455_v1 = vmul.f32 %v864_v62, %v454_v0 }
 0x9d4   :  { %v456_v2 = vadd.f32 %v864_v62, %v455_v1 }
 0x9d6   :  { %v460_v5 = vsel %vm459_vm6, %v864_v62, %v456_v2 }
 0x9d7   :  { %v465_v8 = vsel %vm462_vm7, %v464_v6, %v460_v5  ;;  %v625_v5 = vld [vmem:[#allocation2 + $0x7] sm:$0x1] }
 0x9d8   :  { %v468_v10 = vmul.f32 %v465_v8, %v411_v50 }
 0xa1d   :  { %v471_v7 = vpop.permute.xlu2 %470 }
 0xa1e   :  { %v473_v9 = vmul.f32 %v471_v7, %v465_v8 }
 0xa20   :  { %475 = vrot.lane.b32.xlu0 %v473_v9, %s1055_s16 }
 0xa92   :  { %v476_v11 = vpop.permute.xlu0 %475 }
 0xa93   :  { %v478_v12 = vadd.f32 %v476_v11, %v468_v10 }
 0xa95   :  { %865 = vtanh.f32 %v478_v12 }
 0xa9b   :  { %v866_v13 = vpop.eup %865 }
 0xa9c   :  { %481 = vrot.lane.b32.xlu1 %v866_v13, %s1054_s13 }
 0xb0e   :  { %v482_v14 = vpop.permute.xlu1 %481 }
 0xb0f   :  { %v484_v15 = vmul.f32 %v482_v14, %v465_v8 }
 0xb11   :  { %486 = vrot.lane.b32.xlu2 %v484_v15, %s1055_s16 }
 0xb6b   :  { %v487_v16 = vpop.permute.xlu2 %486 }
 0xb6c   :  { %489 = vst.msk [vmem:[#allocation3 + $0x4] sm:$0x1] %vm220_vm5, %v487_v16  ;;  %806 = vmatmul.msk.f32.vlgmr.msrb.gmra.mxu2 %vm118_vm0, %v487_v16 }
 0xb6d   :  { %490 = vst.msk [vmem:[#allocation4 + $0x3] sm:$0x1] %vm220_vm5, %v487_v16 }
 0xbef   :  { %v511_v18 = vpop.f32.mrf.mxu2 }
 0xbf0   :  { %v514_v19 = vadd.f32 %v511_v18, %v491_v17 }
 0xbf2   :  { %867 = vtanh.f32 %v514_v19  ;;  %v807_v21 = vmul.f32 -1.442695, %v514_v19 }
 0xbf4   :  { %869 = vpow2.f32 %v807_v21 }
 0xbf8   :  { %v868_v20 = vpop.eup %867 }
 0xbf9   :  { %537 = vrot.lane.b32.xlu0 %v868_v20, %s1054_s13 }
 0xbfa   :  { %v870_v22 = vpop.eup %869 }
 0xbfb   :  { %v518_v23 = vadd.f32 1.0, %v870_v22 }
 0xbfd   :  { %871 = vrcp.f32 %v518_v23  ;;  %v530_v29 = vand.u32 2147483648, %v518_v23  ;;  %vm524_vm9 = vweird.f32 %v518_v23  ;;  %v528_v30 = vand.u32 2147483647, %v518_v23 }
 0xbff   :  { %v531_v32 = vor.u32 1.1754944e-38, %v530_v29  ;;  %vm529_vm11 = vcmp.eq.f32.partialorder %v528_v30, 8.507059e+37  ;;  %v696_v30 = vld [vmem:[#allocation11 + $0x18] sm:$0xff] }
 0xc00   :  { %740 = vmatpush.msra.mxu2 %v696_v30 }
 0xc03   :  { %v872_v24 = vpop.eup %871 }
 0xc04   :  { %v520_v25 = vmul.f32 %v872_v24, %v518_v23  ;;  %vm525_vm8 = vweird.f32 %v872_v24 }
 0xc05   :  { %vm526_vm10 = vmor %vm524_vm9, %vm525_vm8 }
 0xc06   :  { %v521_v26 = vsub.f32 1.0, %v520_v25 }
 0xc08   :  { %v522_v27 = vmul.f32 %v872_v24, %v521_v26 }
 0xc0a   :  { %v523_v28 = vadd.f32 %v872_v24, %v522_v27 }
 0xc0c   :  { %v527_v31 = vsel %vm526_vm10, %v872_v24, %v523_v28 }
 0xc0d   :  { %v532_v34 = vsel %vm529_vm11, %v531_v32, %v527_v31  ;;  %v701_v31 = vld [vmem:[#allocation13 + $0x18] sm:$0xff]  ;;  %v695_v32 = vld [vmem:[#allocation11 + $0x10] sm:$0xff] }
 0xc0e   :  { %v535_v36 = vmul.f32 %v532_v34, %v478_v12  ;;  %717 = vmatpush.msra.mxu1 %v701_v31  ;;  %741 = vmatpush.msra.mxu2 %v695_v32 }
 0xc6b   :  { %v538_v33 = vpop.permute.xlu0 %537 }
 0xc6c   :  { %v540_v35 = vmul.f32 %v538_v33, %v532_v34  ;;  %v700_v33 = vld [vmem:[#allocation13 + $0x10] sm:$0xff] }
 0xc6d   :  { %718 = vmatpush.msra.mxu1 %v700_v33 }
 0xc6e   :  { %542 = vrot.lane.b32.xlu1 %v540_v35, %s1055_s16  ;;  %v699_v35 = vld [vmem:[#allocation13 + $0x8] sm:$0xff] }
 0xc6f   :  { %719 = vmatpush.msra.mxu1 %v699_v35 }
 0xce0   :  { %v543_v37 = vpop.permute.xlu1 %542 }
 0xce1   :  { %v545_v38 = vadd.f32 %v543_v37, %v535_v36  ;;  %v693_v36 = vld [vmem:[#allocation11] sm:$0xff] }
 0xce2   :  { %v698_v37 = vld [vmem:[#allocation13] sm:$0xff] }
 0xce3   :  { %873 = vtanh.f32 %v545_v38  ;;  %720 = vmatpush.msra.mxu1 %v698_v37 }
 0xce9   :  { %v874_v39 = vpop.eup %873 }
 0xcea   :  { %548 = vrot.lane.b32.xlu2 %v874_v39, %s1054_s13 }
 0xd44   :  { %v549_v40 = vpop.permute.xlu2 %548 }
 0xd45   :  { %v551_v41 = vmul.f32 %v549_v40, %v532_v34  ;;  %v694_v34 = vld [vmem:[#allocation11 + $0x8] sm:$0xff] }
 0xd46   :  { %742 = vmatpush.msra.mxu2 %v694_v34 }
 0xd47   :  { %553 = vrot.lane.b32.xlu0 %v551_v41, %s1055_s16  ;;  %v826_v41 = vld [vmem:[%s1205_s8] ss:$0 sm:$0xff]  ;;  %s1056_s8 = smov [#allocation14]  }
 0xd48   :  { %743 = vmatpush.msra.mxu2 %v693_v36  ;;  %s781_s17 = sshll.u32 %s1056_s8, 4  ;;  %s782_s17 = int_to_ptr.vmem [resolvable:$true] %s781_s17 }
 0xdb9   :  { %v554_v42 = vpop.permute.xlu0 %553 }
 0xdba   :  { %556 = vst.msk [vmem:[#allocation3 + $0x5] sm:$0x1] %vm220_vm5, %v554_v42  ;;  %808 = vmatmul.msk.f32.vlgmr.msrb.gmra.mxu3 %vm118_vm0, %v554_v42 }
 0xdbb   :  { %557 = vst.msk [vmem:[#allocation4 + $0x2] sm:$0x1] %vm220_vm5, %v554_v42 }
 0xe3d   :  { %v578_v44 = vpop.f32.mrf.mxu3 }
 0xe3e   :  { %v581_v45 = vadd.f32 %v578_v44, %v558_v43 }
 0xe40   :  { %875 = vtanh.f32 %v581_v45  ;;  %v809_v47 = vmul.f32 -1.442695, %v581_v45 }
 0xe42   :  { %877 = vpow2.f32 %v809_v47 }
 0xe46   :  { %v876_v46 = vpop.eup %875 }
 0xe47   :  { %604 = vrot.lane.b32.xlu1 %v876_v46, %s1054_s13 }
 0xe48   :  { %v878_v48 = vpop.eup %877 }
 0xe49   :  { %v585_v49 = vadd.f32 1.0, %v878_v48 }
 0xe4b   :  { %879 = vrcp.f32 %v585_v49  ;;  %v597_v55 = vand.u32 2147483648, %v585_v49  ;;  %vm591_vm13 = vweird.f32 %v585_v49  ;;  %v595_v56 = vand.u32 2147483647, %v585_v49 }
 0xe4d   :  { %v598_v58 = vor.u32 1.1754944e-38, %v597_v55  ;;  %vm596_vm15 = vcmp.eq.f32.partialorder %v595_v56, 8.507059e+37 }
 0xe51   :  { %v880_v50 = vpop.eup %879 }
 0xe52   :  { %v587_v51 = vmul.f32 %v880_v50, %v585_v49  ;;  %vm592_vm12 = vweird.f32 %v880_v50 }
 0xe53   :  { %vm593_vm14 = vmor %vm591_vm13, %vm592_vm12 }
 0xe54   :  { %v588_v52 = vsub.f32 1.0, %v587_v51 }
 0xe56   :  { %v589_v53 = vmul.f32 %v880_v50, %v588_v52 }
 0xe58   :  { %v590_v54 = vadd.f32 %v880_v50, %v589_v53 }
 0xe5a   :  { %v594_v57 = vsel %vm593_vm14, %v880_v50, %v590_v54 }
 0xe5b   :  { %v599_v60 = vsel %vm596_vm15, %v598_v58, %v594_v57 }
 0xe5c   :  { %v602_v62 = vmul.f32 %v599_v60, %v545_v38 }
 0xeb9   :  { %v605_v59 = vpop.permute.xlu1 %604 }
 0xeba   :  { %v607_v61 = vmul.f32 %v605_v59, %v599_v60 }
 0xebc   :  { %609 = vrot.lane.b32.xlu2 %v607_v61, %s1055_s16 }
 0xf16   :  { %v610_v63 = vpop.permute.xlu2 %609 }
 0xf17   :  { %v612_v0 = vadd.f32 %v610_v63, %v602_v62 }
 0xf19   :  { %881 = vtanh.f32 %v612_v0 }
 0xf1f   :  { %v882_v1 = vpop.eup %881 }
 0xf20   :  { %615 = vrot.lane.b32.xlu0 %v882_v1, %s1054_s13 }
 0xf92   :  { %v616_v2 = vpop.permute.xlu0 %615 }
 0xf93   :  { %v618_v3 = vmul.f32 %v616_v2, %v599_v60 }
 0xf95   :  { %620 = vrot.lane.b32.xlu1 %v618_v3, %s1055_s16 }
0x1007   :  { %v621_v4 = vpop.permute.xlu1 %620 }
0x1008   :  { %623 = vst.msk [vmem:[#allocation3 + $0x6] sm:$0x1] %vm220_vm5, %v621_v4  ;;  %810 = vmatmul.msk.f32.vlgmr.msra.gmra.mxu0 %vm118_vm0, %v621_v4 }
0x1009   :  { %624 = vst.msk [vmem:[#allocation4 + $0x1] sm:$0x1] %vm220_vm5, %v621_v4 }
0x1085   :  { %v645_v6 = vpop.f32.mrf.mxu0 }
0x1086   :  { %v648_v7 = vadd.f32 %v645_v6, %v625_v5 }
0x1088   :  { %883 = vtanh.f32 %v648_v7  ;;  %v811_v9 = vmul.f32 -1.442695, %v648_v7 }
0x108a   :  { %885 = vpow2.f32 %v811_v9 }
0x108e   :  { %v884_v8 = vpop.eup %883 }
0x108f   :  { %671 = vrot.lane.b32.xlu2 %v884_v8, %s1054_s13 }
0x1090   :  { %v886_v10 = vpop.eup %885 }
0x1091   :  { %v652_v11 = vadd.f32 1.0, %v886_v10 }
0x1093   :  { %887 = vrcp.f32 %v652_v11  ;;  %v664_v17 = vand.u32 2147483648, %v652_v11  ;;  %vm658_vm2 = vweird.f32 %v652_v11  ;;  %v662_v18 = vand.u32 2147483647, %v652_v11 }
0x1095   :  { %v665_v20 = vor.u32 1.1754944e-38, %v664_v17  ;;  %vm663_vm4 = vcmp.eq.f32.partialorder %v662_v18, 8.507059e+37 }
0x1099   :  { %v888_v12 = vpop.eup %887 }
0x109a   :  { %v654_v13 = vmul.f32 %v888_v12, %v652_v11  ;;  %vm659_vm1 = vweird.f32 %v888_v12 }
0x109b   :  { %vm660_vm3 = vmor %vm658_vm2, %vm659_vm1 }
0x109c   :  { %v655_v14 = vsub.f32 1.0, %v654_v13 }
0x109e   :  { %v656_v15 = vmul.f32 %v888_v12, %v655_v14 }
0x10a0   :  { %v657_v16 = vadd.f32 %v888_v12, %v656_v15 }
0x10a2   :  { %v661_v19 = vsel %vm660_vm3, %v888_v12, %v657_v16 }
0x10a3   :  { %v666_v22 = vsel %vm663_vm4, %v665_v20, %v661_v19 }
0x10a4   :  { %v669_v24 = vmul.f32 %v666_v22, %v612_v0 }
0x10e9   :  { %v672_v21 = vpop.permute.xlu2 %671 }
0x10ea   :  { %v674_v23 = vmul.f32 %v672_v21, %v666_v22 }
0x10ec   :  { %676 = vrot.lane.b32.xlu0 %v674_v23, %s1055_s16 }
0x115e   :  { %v677_v25 = vpop.permute.xlu0 %676 }
0x115f   :  { %v679_v26 = vadd.f32 %v677_v25, %v669_v24 }
0x1161   :  { %889 = vtanh.f32 %v679_v26 }
0x1167   :  { %v890_v27 = vpop.eup %889 }
0x1168   :  { %682 = vrot.lane.b32.xlu1 %v890_v27, %s1054_s13 }
0x11da   :  { %v683_v28 = vpop.permute.xlu1 %682 }
0x11db   :  { %v685_v29 = vmul.f32 %v683_v28, %v666_v22 }
0x11dd   :  { %687 = vrot.lane.b32.xlu2 %v685_v29, %s1055_s16 }
0x1237   :  { %v688_v38 = vpop.permute.xlu2 %687 }
0x1238   :  { %690 = vst.msk [vmem:[#allocation3 + $0x7] sm:$0x1] %vm220_vm5, %v688_v38 }
0x1239   :  { %691 = vst.msk [vmem:[#allocation4] sm:$0x1] %vm220_vm5, %v688_v38 }
0x123f   :  { %v692_v39 = vld [vmem:[#allocation3] sm:$0xff] }
0x1240   :  { %v697_v40 = vld [vmem:[#allocation4] sm:$0xff]  ;;  %813 = vmatmul.msk.f32.vlgmr.msra.gmra.mxu2 %vm118_vm0, %v692_v39 }
0x1241   :  { %812 = vmatmul.msk.f32.vlgmr.msra.gmra.mxu1 %vm118_vm0, %v697_v40 }
0x12be   :  { %v722_v42 = vpop.f32.mrf.mxu1 }
0x12c3   :  { %v745_v43 = vpop.f32.mrf.mxu2 }
0x12c4   :  { %v746_v44 = vadd.f32 %v745_v43, %v722_v42 }
0x12c6   :  { %v752_v45 = vadd.f32 %v826_v41, %v746_v44 }
0x12c8   :  { %753 = vmax.xlane.f32.xlu0 %v752_v45 }
0x133b   :  { %v754_v46 = vpop.xlane.xlu0 %753 }
0x133c   :  { %v755_v47 = vsub.f32 %v752_v45, %v754_v46 }
0x133e   :  { %v756_v48 = vmul.f32 1.442695, %v755_v47 }
0x1340   :  { %891 = vpow2.f32 %v756_v48 }
0x1346   :  { %v892_v49 = vpop.eup %891 }
0x1347   :  { %758 = vadd.xlane.f32.xlu1 %v892_v49 }
0x13ba   :  { %v759_v50 = vpop.xlane.xlu1 %758 }
0x13bb   :  { %893 = vrcp.f32 %v759_v50  ;;  %v771_v54 = vand.u32 2147483648, %v759_v50  ;;  %v769_v56 = vand.u32 2147483647, %v759_v50  ;;  %vm765_vm5 = vweird.f32 %v759_v50 }
0x13bd   :  { %v772_v58 = vor.u32 1.1754944e-38, %v771_v54  ;;  %vm770_vm7 = vcmp.eq.f32.partialorder %v769_v56, 8.507059e+37 }
0x13c1   :  { %v894_v51 = vpop.eup %893 }
0x13c2   :  { %v761_v52 = vmul.f32 %v894_v51, %v759_v50  ;;  %vm766_vm0 = vweird.f32 %v894_v51 }
0x13c3   :  { %vm767_vm6 = vmor %vm765_vm5, %vm766_vm0 }
0x13c4   :  { %v762_v53 = vsub.f32 1.0, %v761_v52 }
0x13c6   :  { %v763_v55 = vmul.f32 %v894_v51, %v762_v53 }
0x13c8   :  { %v764_v57 = vadd.f32 %v894_v51, %v763_v55 }
0x13ca   :  { %v768_v59 = vsel %vm767_vm6, %v894_v51, %v764_v57 }
0x13cb   :  { %v773_v60 = vsel %vm770_vm7, %v772_v58, %v768_v59 }
0x13cc   :  { %v774_v61 = vmul.f32 %v892_v49, %v773_v60 }
0x13ce   :  { %775 = vst [vmem:[#allocation14] sm:$0xff] %v774_v61 }
0x13cf   :  { %786 = dma.vmem_to_hbm [thread:$0]  %s782_s17, 128, %s784_s20, [#allocation7]  }
0x13d0   :  { %1045 = dma.done.wait [#allocation7], 128  }
0x13d1   :  { %1046 = vsyncadd [#allocation7], 4294967168 }
0x13d2   :  { %791 = vsyncpa [#allocation6], 1 }
0x13d3   :  { %792 = vsyncpa [#allocation9], 1 }
0x13d4   :  { %793 = vsyncpa [#allocation12], 1 }
0x13d5   :  { %794 = vsyncpa [#allocation7], 1 }

</bundles_post_ra>
